<compile_context>
chip_gen: v7x
topology: tpu7x:2x2x1
jax: 0.10.0
libtpu: 0.0.40
codegen_flags: <defaults>
</compile_context>

<pallas_src>
import functools

import jax
import jax.numpy as jnp
from jax.experimental import pallas as pl
from jax.experimental.pallas import tpu as pltpu

# ------------------------------- config --------------------------------------
N_NODES = 8            # number of graph nodes
HIDDEN = 8             # hidden_size (= out_channels per head)
N_HEAD = 2             # n_head
NEG_SLOPE = 0.2        # GATv2Conv default negative_slope

HC = HIDDEN * N_HEAD   # 16  (concat=True output width)
D_IN1 = HIDDEN         # gat1 input dim
D_IN2 = HC             # gat2 input dim

# packed parameter-vector layout (one lane-dense (1, 128) row)
OFF_B1 = 0             # [b_l1 | b_r1]  -> 2*HC = 32
OFF_B2 = 32            # [b_l2 | b_r2]  -> 32
OFF_BIAS1 = 64         # final bias of gat1 -> 16
OFF_BIAS2 = 80         # final bias of gat2 -> 16
OFF_ATT1 = 96          # att1 flattened head-major -> 16
OFF_ATT2 = 112         # att2 flattened head-major -> 16
PVEC_LEN = 128


# -------------------------------- kernel -------------------------------------
def gat_encoder_kernel(x_ref, adj_ref, w1_ref, w2_ref, pvec_ref,
                       h_ref, logp_ref, *, heads, c, neg_slope):
    hc = heads * c
    adj_mask = adj_ref[...] > 0.5          # (N, N): adj[i, j] = 1 iff edge j -> i
    pv = pvec_ref[...]                      # (1, 128) packed vectors

    def gatv2(x_in, w, b_lr, att_off, bias_out):
        # single fused matmul produces both lin_l and lin_r outputs
        y = jnp.dot(x_in, w, preferred_element_type=jnp.float32) + b_lr  # (N, 2*H*C)
        x_l = y[:, :hc]                     # source-side features
        x_r = y[:, hc:]                     # target-side features
        outs = []
        for h in range(heads):
            xl_h = x_l[:, h * c:(h + 1) * c]                 # (N, C)
            xr_h = x_r[:, h * c:(h + 1) * c]                 # (N, C)
            # pairwise GATv2 pre-activation: p[i, j, :] = x_r[i] + x_l[j]
            p = xr_h[:, None, :] + xl_h[None, :, :]          # (N, N, C)
            p = jnp.where(p > 0, p, neg_slope * p)           # LeakyReLU
            a = pv[:, att_off + h * c: att_off + (h + 1) * c]  # (1, C)
            s = jnp.sum(p * a[None, :, :], axis=-1)          # (N, N) scores
            # masked softmax over sources j for each target i
            s = jnp.where(adj_mask, s, -1e30)
            s = s - jnp.max(s, axis=-1, keepdims=True)
            e = jnp.exp(s)
            alpha = e / jnp.sum(e, axis=-1, keepdims=True)
            # aggregate messages: out[i] = sum_j alpha[i, j] * x_l[j]
            outs.append(jnp.dot(alpha, xl_h, preferred_element_type=jnp.float32))
        return jnp.concatenate(outs, axis=-1) + bias_out     # (N, H*C)

    # ---- gat1 + ELU ----
    h1 = gatv2(x_ref[...], w1_ref[...],
               pv[:, OFF_B1:OFF_B1 + 2 * hc], OFF_ATT1,
               pv[:, OFF_BIAS1:OFF_BIAS1 + hc])
    h1 = jnp.where(h1 > 0, h1, jnp.exp(h1) - 1.0)            # ELU(alpha=1)

    # ---- gat2 ----
    h2 = gatv2(h1, w2_ref[...],
               pv[:, OFF_B2:OFF_B2 + 2 * hc], OFF_ATT2,
               pv[:, OFF_BIAS2:OFF_BIAS2 + hc])

    h_ref[...] = h2
    # ---- log_softmax over the feature dim (dim=1) ----
    m = jnp.max(h2, axis=-1, keepdims=True)
    z = h2 - m
    lse = jnp.log(jnp.sum(jnp.exp(z), axis=-1, keepdims=True))
    logp_ref[...] = z - lse


# -------------------------------- wrapper -------------------------------------
def gat_encoder_forward(x, edge_index, params):
    n = x.shape[0]
    src, dst = edge_index[0], edge_index[1]
    # adj[i, j] = 1 iff edge j -> i (source_to_target flow); add self-loops
    adj = jnp.zeros((n, n), jnp.float32).at[dst, src].set(1.0)
    adj = adj.at[jnp.arange(n), jnp.arange(n)].set(1.0)

    # pack [W_l | W_r] per layer -> one matmul per layer inside the kernel
    w1 = jnp.concatenate([params["w_l1"], params["w_r1"]], axis=1)   # (D_IN1, 2*HC)
    w2 = jnp.concatenate([params["w_l2"], params["w_r2"]], axis=1)   # (D_IN2, 2*HC)

    # pack every small vector into a single lane-dense (1, 128) row (one DMA)
    pvec = jnp.concatenate([
        params["b_l1"], params["b_r1"],
        params["b_l2"], params["b_r2"],
        params["bias1"], params["bias2"],
        params["att1"].reshape(-1), params["att2"].reshape(-1),
    ]).reshape(1, PVEC_LEN).astype(jnp.float32)

    kernel = functools.partial(gat_encoder_kernel,
                               heads=N_HEAD, c=HIDDEN, neg_slope=NEG_SLOPE)
    vmem = pl.BlockSpec(memory_space=pltpu.MemorySpace.VMEM)
    h, logp = pl.pallas_call(
        kernel,
        out_shape=(jax.ShapeDtypeStruct((n, HC), jnp.float32),
                   jax.ShapeDtypeStruct((n, HC), jnp.float32)),
        in_specs=[vmem] * 5,
        out_specs=(vmem, vmem),
    )(x.astype(jnp.float32), adj, w1, w2, pvec)
    return h, logp


# ------------------------ pure-JAX reference (for check) ----------------------
def gat_encoder_reference(x, edge_index, params):
    n = x.shape[0]
    src, dst = edge_index[0], edge_index[1]
    adj = jnp.zeros((n, n), jnp.float32).at[dst, src].set(1.0)
    adj = adj.at[jnp.arange(n), jnp.arange(n)].set(1.0)
    mask = adj > 0.5

    def gatv2(x_in, w_l, w_r, b_l, b_r, att, bias):
        xl = (x_in @ w_l + b_l).reshape(n, N_HEAD, HIDDEN)
        xr = (x_in @ w_r + b_r).reshape(n, N_HEAD, HIDDEN)
        p = xr[:, None, :, :] + xl[None, :, :, :]            # (i, j, h, c)
        p = jnp.where(p > 0, p, NEG_SLOPE * p)
        s = jnp.einsum("ijhc,hc->hij", p, att)               # (H, N, N)
        s = jnp.where(mask[None], s, -jnp.inf)
        alpha = jax.nn.softmax(s, axis=-1)
        out = jnp.einsum("hij,jhc->ihc", alpha, xl)          # (N, H, C)
        return out.reshape(n, N_HEAD * HIDDEN) + bias

    h1 = gatv2(x, params["w_l1"], params["w_r1"], params["b_l1"], params["b_r1"],
               params["att1"], params["bias1"])
    h1 = jax.nn.elu(h1)
    h2 = gatv2(h1, params["w_l2"], params["w_r2"], params["b_l2"], params["b_r2"],
               params["att2"], params["bias2"])
    return h2, jax.nn.log_softmax(h2, axis=1)


# ------------------------------- param init -----------------------------------
def init_params(key):
    ks = jax.random.split(key, 12)
    s = 0.3
    return {
        "w_l1": s * jax.random.normal(ks[0], (D_IN1, HC), jnp.float32),
        "w_r1": s * jax.random.normal(ks[1], (D_IN1, HC), jnp.float32),
        "b_l1": s * jax.random.normal(ks[2], (HC,), jnp.float32),
        "b_r1": s * jax.random.normal(ks[3], (HC,), jnp.float32),
        "att1": s * jax.random.normal(ks[4], (N_HEAD, HIDDEN), jnp.float32),
        "bias1": s * jax.random.normal(ks[5], (HC,), jnp.float32),
        "w_l2": s * jax.random.normal(ks[6], (D_IN2, HC), jnp.float32),
        "w_r2": s * jax.random.normal(ks[7], (D_IN2, HC), jnp.float32),
        "b_l2": s * jax.random.normal(ks[8], (HC,), jnp.float32),
        "b_r2": s * jax.random.normal(ks[9], (HC,), jnp.float32),
        "att2": s * jax.random.normal(ks[10], (N_HEAD, HIDDEN), jnp.float32),
        "bias2": s * jax.random.normal(ks[11], (HC,), jnp.float32),
    }


if __name__ == "__main__":
    key = jax.random.PRNGKey(0)
    kx, kp = jax.random.split(key, 2)

    x = jax.random.normal(kx, (N_NODES, HIDDEN), jnp.float32)
    # deterministic small graph: directed ring + a few chords (no duplicates)
    src = jnp.array([0, 1, 2, 3, 4, 5, 6, 7, 0, 2, 4, 6], dtype=jnp.int32)
    dst = jnp.array([1, 2, 3, 4, 5, 6, 7, 0, 4, 6, 0, 2], dtype=jnp.int32)
    edge_index = jnp.stack([src, dst])

    params = init_params(kp)

    h, logp = gat_encoder_forward(x, edge_index, params)
    h = jax.block_until_ready(h)
    logp = jax.block_until_ready(logp)

    h_ref, logp_ref = gat_encoder_reference(x, edge_index, params)
    assert jnp.allclose(h, h_ref, atol=1e-4, rtol=1e-4), (h, h_ref)
    assert jnp.allclose(logp, logp_ref, atol=1e-4, rtol=1e-4), (logp, logp_ref)

    print("KERNEL_OK")
</pallas_src>

<mosaic_0001>
module attributes {stable_mosaic.version = 11 : i64} {
  func.func @gat_encoder_kernel(%arg0: memref<8x8xf32, #tpu.memory_space<vmem>>, %arg1: memref<8x8xf32, #tpu.memory_space<vmem>>, %arg2: memref<8x32xf32, #tpu.memory_space<vmem>>, %arg3: memref<16x32xf32, #tpu.memory_space<vmem>>, %arg4: memref<1x128xf32, #tpu.memory_space<vmem>>, %arg5: memref<8x16xf32, #tpu.memory_space<vmem>>, %arg6: memref<8x16xf32, #tpu.memory_space<vmem>>) attributes {dimension_semantics = [], scalar_prefetch = 0 : i64, scratch_operands = 0 : i64, tpu.core_type = #tpu.core_type<tc>} {
    %c0 = arith.constant 0 : index
    %c0_0 = arith.constant 0 : index
    %0 = vector.load %arg1[%c0, %c0_0] : memref<8x8xf32, #tpu.memory_space<vmem>>, vector<8x8xf32>
    %cst = arith.constant 5.000000e-01 : f32
    %1 = vector.broadcast %cst : f32 to vector<8x8xf32>
    %2 = arith.cmpf ogt, %0, %1 : vector<8x8xf32>
    %c0_1 = arith.constant 0 : index
    %c0_2 = arith.constant 0 : index
    %3 = vector.load %arg4[%c0_1, %c0_2] : memref<1x128xf32, #tpu.memory_space<vmem>>, vector<1x128xf32>
    %c0_3 = arith.constant 0 : index
    %c0_4 = arith.constant 0 : index
    %4 = vector.load %arg0[%c0_3, %c0_4] : memref<8x8xf32, #tpu.memory_space<vmem>>, vector<8x8xf32>
    %c0_5 = arith.constant 0 : index
    %c0_6 = arith.constant 0 : index
    %5 = vector.load %arg2[%c0_5, %c0_6] : memref<8x32xf32, #tpu.memory_space<vmem>>, vector<8x32xf32>
    %6 = vector.extract_strided_slice %3 {offsets = [0, 0], sizes = [1, 32], strides = [1, 1]} : vector<1x128xf32> to vector<1x32xf32>
    %7 = vector.extract_strided_slice %3 {offsets = [0, 64], sizes = [1, 16], strides = [1, 1]} : vector<1x128xf32> to vector<1x16xf32>
    %cst_7 = arith.constant dense<0.000000e+00> : vector<8x32xf32>
    %8 = tpu.matmul %4, %5, %cst_7 {dimension_numbers = #tpu.dot_dimension_numbers<[1], [0], [0], [1], [0, 0, 1, 1], [], []>} : vector<8x8xf32>, vector<8x32xf32>, vector<8x32xf32> -> vector<8x32xf32>
    %9 = vector.broadcast %6 : vector<1x32xf32> to vector<8x32xf32>
    %10 = arith.addf %8, %9 : vector<8x32xf32>
    %11 = vector.extract_strided_slice %10 {offsets = [0, 0], sizes = [8, 16], strides = [1, 1]} : vector<8x32xf32> to vector<8x16xf32>
    %12 = vector.extract_strided_slice %10 {offsets = [0, 16], sizes = [8, 16], strides = [1, 1]} : vector<8x32xf32> to vector<8x16xf32>
    %13 = vector.extract_strided_slice %11 {offsets = [0, 0], sizes = [8, 8], strides = [1, 1]} : vector<8x16xf32> to vector<8x8xf32>
    %14 = vector.extract_strided_slice %12 {offsets = [0, 0], sizes = [8, 8], strides = [1, 1]} : vector<8x16xf32> to vector<8x8xf32>
    %15 = vector.shape_cast %14 : vector<8x8xf32> to vector<8x1x8xf32>
    %16 = vector.shape_cast %13 : vector<8x8xf32> to vector<1x8x8xf32>
    %17 = vector.broadcast %15 : vector<8x1x8xf32> to vector<8x8x8xf32>
    %18 = vector.broadcast %16 : vector<1x8x8xf32> to vector<8x8x8xf32>
    %19 = arith.addf %17, %18 : vector<8x8x8xf32>
    %cst_8 = arith.constant 0.000000e+00 : f32
    %20 = vector.broadcast %cst_8 : f32 to vector<8x8x8xf32>
    %21 = arith.cmpf ogt, %19, %20 : vector<8x8x8xf32>
    %cst_9 = arith.constant 2.000000e-01 : f32
    %22 = vector.broadcast %cst_9 : f32 to vector<8x8x8xf32>
    %23 = arith.mulf %22, %19 : vector<8x8x8xf32>
    %24 = arith.select %21, %19, %23 : vector<8x8x8xi1>, vector<8x8x8xf32>
    %25 = vector.extract_strided_slice %3 {offsets = [0, 96], sizes = [1, 8], strides = [1, 1]} : vector<1x128xf32> to vector<1x8xf32>
    %26 = vector.shape_cast %25 : vector<1x8xf32> to vector<1x1x8xf32>
    %27 = vector.broadcast %26 : vector<1x1x8xf32> to vector<8x8x8xf32>
    %28 = arith.mulf %24, %27 : vector<8x8x8xf32>
    %cst_10 = arith.constant dense<0.000000e+00> : vector<8x8xf32>
    %29 = vector.multi_reduction <add>, %28, %cst_10 [2] : vector<8x8x8xf32> to vector<8x8xf32>
    %cst_11 = arith.constant -1.000000e+30 : f32
    %30 = vector.broadcast %cst_11 : f32 to vector<8x8xf32>
    %31 = arith.select %2, %29, %30 : vector<8x8xi1>, vector<8x8xf32>
    %cst_12 = arith.constant dense<0xFF800000> : vector<8xf32>
    %32 = vector.multi_reduction <maximumf>, %31, %cst_12 [1] : vector<8x8xf32> to vector<8xf32>
    %33 = vector.shape_cast %32 : vector<8xf32> to vector<8x1xf32>
    %34 = vector.broadcast %33 : vector<8x1xf32> to vector<8x8xf32>
    %35 = arith.subf %31, %34 : vector<8x8xf32>
    %36 = math.exp %35 : vector<8x8xf32>
    %cst_13 = arith.constant dense<0.000000e+00> : vector<8xf32>
    %37 = vector.multi_reduction <add>, %36, %cst_13 [1] : vector<8x8xf32> to vector<8xf32>
    %38 = vector.shape_cast %37 : vector<8xf32> to vector<8x1xf32>
    %39 = vector.broadcast %38 : vector<8x1xf32> to vector<8x8xf32>
    %40 = arith.divf %36, %39 : vector<8x8xf32>
    %cst_14 = arith.constant dense<0.000000e+00> : vector<8x8xf32>
    %41 = tpu.matmul %40, %13, %cst_14 {dimension_numbers = #tpu.dot_dimension_numbers<[1], [0], [0], [1], [0, 0, 1, 1], [], []>} : vector<8x8xf32>, vector<8x8xf32>, vector<8x8xf32> -> vector<8x8xf32>
    %42 = vector.extract_strided_slice %11 {offsets = [0, 8], sizes = [8, 8], strides = [1, 1]} : vector<8x16xf32> to vector<8x8xf32>
    %43 = vector.extract_strided_slice %12 {offsets = [0, 8], sizes = [8, 8], strides = [1, 1]} : vector<8x16xf32> to vector<8x8xf32>
    %44 = vector.shape_cast %43 : vector<8x8xf32> to vector<8x1x8xf32>
    %45 = vector.shape_cast %42 : vector<8x8xf32> to vector<1x8x8xf32>
    %46 = vector.broadcast %44 : vector<8x1x8xf32> to vector<8x8x8xf32>
    %47 = vector.broadcast %45 : vector<1x8x8xf32> to vector<8x8x8xf32>
    %48 = arith.addf %46, %47 : vector<8x8x8xf32>
    %cst_15 = arith.constant 0.000000e+00 : f32
    %49 = vector.broadcast %cst_15 : f32 to vector<8x8x8xf32>
    %50 = arith.cmpf ogt, %48, %49 : vector<8x8x8xf32>
    %cst_16 = arith.constant 2.000000e-01 : f32
    %51 = vector.broadcast %cst_16 : f32 to vector<8x8x8xf32>
    %52 = arith.mulf %51, %48 : vector<8x8x8xf32>
    %53 = arith.select %50, %48, %52 : vector<8x8x8xi1>, vector<8x8x8xf32>
    %54 = vector.extract_strided_slice %3 {offsets = [0, 104], sizes = [1, 8], strides = [1, 1]} : vector<1x128xf32> to vector<1x8xf32>
    %55 = vector.shape_cast %54 : vector<1x8xf32> to vector<1x1x8xf32>
    %56 = vector.broadcast %55 : vector<1x1x8xf32> to vector<8x8x8xf32>
    %57 = arith.mulf %53, %56 : vector<8x8x8xf32>
    %cst_17 = arith.constant dense<0.000000e+00> : vector<8x8xf32>
    %58 = vector.multi_reduction <add>, %57, %cst_17 [2] : vector<8x8x8xf32> to vector<8x8xf32>
    %cst_18 = arith.constant -1.000000e+30 : f32
    %59 = vector.broadcast %cst_18 : f32 to vector<8x8xf32>
    %60 = arith.select %2, %58, %59 : vector<8x8xi1>, vector<8x8xf32>
    %cst_19 = arith.constant dense<0xFF800000> : vector<8xf32>
    %61 = vector.multi_reduction <maximumf>, %60, %cst_19 [1] : vector<8x8xf32> to vector<8xf32>
    %62 = vector.shape_cast %61 : vector<8xf32> to vector<8x1xf32>
    %63 = vector.broadcast %62 : vector<8x1xf32> to vector<8x8xf32>
    %64 = arith.subf %60, %63 : vector<8x8xf32>
    %65 = math.exp %64 : vector<8x8xf32>
    %cst_20 = arith.constant dense<0.000000e+00> : vector<8xf32>
    %66 = vector.multi_reduction <add>, %65, %cst_20 [1] : vector<8x8xf32> to vector<8xf32>
    %67 = vector.shape_cast %66 : vector<8xf32> to vector<8x1xf32>
    %68 = vector.broadcast %67 : vector<8x1xf32> to vector<8x8xf32>
    %69 = arith.divf %65, %68 : vector<8x8xf32>
    %cst_21 = arith.constant dense<0.000000e+00> : vector<8x8xf32>
    %70 = tpu.matmul %69, %42, %cst_21 {dimension_numbers = #tpu.dot_dimension_numbers<[1], [0], [0], [1], [0, 0, 1, 1], [], []>} : vector<8x8xf32>, vector<8x8xf32>, vector<8x8xf32> -> vector<8x8xf32>
    %71 = tpu.concatenate %41, %70 in 1 : vector<8x8xf32>, vector<8x8xf32> -> vector<8x16xf32>
    %72 = vector.broadcast %7 : vector<1x16xf32> to vector<8x16xf32>
    %73 = arith.addf %71, %72 : vector<8x16xf32>
    %cst_22 = arith.constant 0.000000e+00 : f32
    %74 = vector.broadcast %cst_22 : f32 to vector<8x16xf32>
    %75 = arith.cmpf ogt, %73, %74 : vector<8x16xf32>
    %76 = math.exp %73 : vector<8x16xf32>
    %cst_23 = arith.constant 1.000000e+00 : f32
    %77 = vector.broadcast %cst_23 : f32 to vector<8x16xf32>
    %78 = arith.subf %76, %77 : vector<8x16xf32>
    %79 = arith.select %75, %73, %78 : vector<8x16xi1>, vector<8x16xf32>
    %c0_24 = arith.constant 0 : index
    %c0_25 = arith.constant 0 : index
    %80 = vector.load %arg3[%c0_24, %c0_25] : memref<16x32xf32, #tpu.memory_space<vmem>>, vector<16x32xf32>
    %81 = vector.extract_strided_slice %3 {offsets = [0, 32], sizes = [1, 32], strides = [1, 1]} : vector<1x128xf32> to vector<1x32xf32>
    %82 = vector.extract_strided_slice %3 {offsets = [0, 80], sizes = [1, 16], strides = [1, 1]} : vector<1x128xf32> to vector<1x16xf32>
    %cst_26 = arith.constant dense<0.000000e+00> : vector<8x32xf32>
    %83 = tpu.matmul %79, %80, %cst_26 {dimension_numbers = #tpu.dot_dimension_numbers<[1], [0], [0], [1], [0, 0, 1, 1], [], []>} : vector<8x16xf32>, vector<16x32xf32>, vector<8x32xf32> -> vector<8x32xf32>
    %84 = vector.broadcast %81 : vector<1x32xf32> to vector<8x32xf32>
    %85 = arith.addf %83, %84 : vector<8x32xf32>
    %86 = vector.extract_strided_slice %85 {offsets = [0, 0], sizes = [8, 16], strides = [1, 1]} : vector<8x32xf32> to vector<8x16xf32>
    %87 = vector.extract_strided_slice %85 {offsets = [0, 16], sizes = [8, 16], strides = [1, 1]} : vector<8x32xf32> to vector<8x16xf32>
    %88 = vector.extract_strided_slice %86 {offsets = [0, 0], sizes = [8, 8], strides = [1, 1]} : vector<8x16xf32> to vector<8x8xf32>
    %89 = vector.extract_strided_slice %87 {offsets = [0, 0], sizes = [8, 8], strides = [1, 1]} : vector<8x16xf32> to vector<8x8xf32>
    %90 = vector.shape_cast %89 : vector<8x8xf32> to vector<8x1x8xf32>
    %91 = vector.shape_cast %88 : vector<8x8xf32> to vector<1x8x8xf32>
    %92 = vector.broadcast %90 : vector<8x1x8xf32> to vector<8x8x8xf32>
    %93 = vector.broadcast %91 : vector<1x8x8xf32> to vector<8x8x8xf32>
    %94 = arith.addf %92, %93 : vector<8x8x8xf32>
    %cst_27 = arith.constant 0.000000e+00 : f32
    %95 = vector.broadcast %cst_27 : f32 to vector<8x8x8xf32>
    %96 = arith.cmpf ogt, %94, %95 : vector<8x8x8xf32>
    %cst_28 = arith.constant 2.000000e-01 : f32
    %97 = vector.broadcast %cst_28 : f32 to vector<8x8x8xf32>
    %98 = arith.mulf %97, %94 : vector<8x8x8xf32>
    %99 = arith.select %96, %94, %98 : vector<8x8x8xi1>, vector<8x8x8xf32>
    %100 = vector.extract_strided_slice %3 {offsets = [0, 112], sizes = [1, 8], strides = [1, 1]} : vector<1x128xf32> to vector<1x8xf32>
    %101 = vector.shape_cast %100 : vector<1x8xf32> to vector<1x1x8xf32>
    %102 = vector.broadcast %101 : vector<1x1x8xf32> to vector<8x8x8xf32>
    %103 = arith.mulf %99, %102 : vector<8x8x8xf32>
    %cst_29 = arith.constant dense<0.000000e+00> : vector<8x8xf32>
    %104 = vector.multi_reduction <add>, %103, %cst_29 [2] : vector<8x8x8xf32> to vector<8x8xf32>
    %cst_30 = arith.constant -1.000000e+30 : f32
    %105 = vector.broadcast %cst_30 : f32 to vector<8x8xf32>
    %106 = arith.select %2, %104, %105 : vector<8x8xi1>, vector<8x8xf32>
    %cst_31 = arith.constant dense<0xFF800000> : vector<8xf32>
    %107 = vector.multi_reduction <maximumf>, %106, %cst_31 [1] : vector<8x8xf32> to vector<8xf32>
    %108 = vector.shape_cast %107 : vector<8xf32> to vector<8x1xf32>
    %109 = vector.broadcast %108 : vector<8x1xf32> to vector<8x8xf32>
    %110 = arith.subf %106, %109 : vector<8x8xf32>
    %111 = math.exp %110 : vector<8x8xf32>
    %cst_32 = arith.constant dense<0.000000e+00> : vector<8xf32>
    %112 = vector.multi_reduction <add>, %111, %cst_32 [1] : vector<8x8xf32> to vector<8xf32>
    %113 = vector.shape_cast %112 : vector<8xf32> to vector<8x1xf32>
    %114 = vector.broadcast %113 : vector<8x1xf32> to vector<8x8xf32>
    %115 = arith.divf %111, %114 : vector<8x8xf32>
    %cst_33 = arith.constant dense<0.000000e+00> : vector<8x8xf32>
    %116 = tpu.matmul %115, %88, %cst_33 {dimension_numbers = #tpu.dot_dimension_numbers<[1], [0], [0], [1], [0, 0, 1, 1], [], []>} : vector<8x8xf32>, vector<8x8xf32>, vector<8x8xf32> -> vector<8x8xf32>
    %117 = vector.extract_strided_slice %86 {offsets = [0, 8], sizes = [8, 8], strides = [1, 1]} : vector<8x16xf32> to vector<8x8xf32>
    %118 = vector.extract_strided_slice %87 {offsets = [0, 8], sizes = [8, 8], strides = [1, 1]} : vector<8x16xf32> to vector<8x8xf32>
    %119 = vector.shape_cast %118 : vector<8x8xf32> to vector<8x1x8xf32>
    %120 = vector.shape_cast %117 : vector<8x8xf32> to vector<1x8x8xf32>
    %121 = vector.broadcast %119 : vector<8x1x8xf32> to vector<8x8x8xf32>
    %122 = vector.broadcast %120 : vector<1x8x8xf32> to vector<8x8x8xf32>
    %123 = arith.addf %121, %122 : vector<8x8x8xf32>
    %cst_34 = arith.constant 0.000000e+00 : f32
    %124 = vector.broadcast %cst_34 : f32 to vector<8x8x8xf32>
    %125 = arith.cmpf ogt, %123, %124 : vector<8x8x8xf32>
    %cst_35 = arith.constant 2.000000e-01 : f32
    %126 = vector.broadcast %cst_35 : f32 to vector<8x8x8xf32>
    %127 = arith.mulf %126, %123 : vector<8x8x8xf32>
    %128 = arith.select %125, %123, %127 : vector<8x8x8xi1>, vector<8x8x8xf32>
    %129 = vector.extract_strided_slice %3 {offsets = [0, 120], sizes = [1, 8], strides = [1, 1]} : vector<1x128xf32> to vector<1x8xf32>
    %130 = vector.shape_cast %129 : vector<1x8xf32> to vector<1x1x8xf32>
    %131 = vector.broadcast %130 : vector<1x1x8xf32> to vector<8x8x8xf32>
    %132 = arith.mulf %128, %131 : vector<8x8x8xf32>
    %cst_36 = arith.constant dense<0.000000e+00> : vector<8x8xf32>
    %133 = vector.multi_reduction <add>, %132, %cst_36 [2] : vector<8x8x8xf32> to vector<8x8xf32>
    %cst_37 = arith.constant -1.000000e+30 : f32
    %134 = vector.broadcast %cst_37 : f32 to vector<8x8xf32>
    %135 = arith.select %2, %133, %134 : vector<8x8xi1>, vector<8x8xf32>
    %cst_38 = arith.constant dense<0xFF800000> : vector<8xf32>
    %136 = vector.multi_reduction <maximumf>, %135, %cst_38 [1] : vector<8x8xf32> to vector<8xf32>
    %137 = vector.shape_cast %136 : vector<8xf32> to vector<8x1xf32>
    %138 = vector.broadcast %137 : vector<8x1xf32> to vector<8x8xf32>
    %139 = arith.subf %135, %138 : vector<8x8xf32>
    %140 = math.exp %139 : vector<8x8xf32>
    %cst_39 = arith.constant dense<0.000000e+00> : vector<8xf32>
    %141 = vector.multi_reduction <add>, %140, %cst_39 [1] : vector<8x8xf32> to vector<8xf32>
    %142 = vector.shape_cast %141 : vector<8xf32> to vector<8x1xf32>
    %143 = vector.broadcast %142 : vector<8x1xf32> to vector<8x8xf32>
    %144 = arith.divf %140, %143 : vector<8x8xf32>
    %cst_40 = arith.constant dense<0.000000e+00> : vector<8x8xf32>
    %145 = tpu.matmul %144, %117, %cst_40 {dimension_numbers = #tpu.dot_dimension_numbers<[1], [0], [0], [1], [0, 0, 1, 1], [], []>} : vector<8x8xf32>, vector<8x8xf32>, vector<8x8xf32> -> vector<8x8xf32>
    %146 = tpu.concatenate %116, %145 in 1 : vector<8x8xf32>, vector<8x8xf32> -> vector<8x16xf32>
    %147 = vector.broadcast %82 : vector<1x16xf32> to vector<8x16xf32>
    %148 = arith.addf %146, %147 : vector<8x16xf32>
    %c0_41 = arith.constant 0 : index
    %c0_42 = arith.constant 0 : index
    %149 = vector.load %arg5[%c0_41, %c0_42] : memref<8x16xf32, #tpu.memory_space<vmem>>, vector<8x16xf32>
    tpu.vector_store %arg5[%c0_41, %c0_42], %148 {strides = array<i32>} : memref<8x16xf32, #tpu.memory_space<vmem>>, vector<8x16xf32>,
    %cst_43 = arith.constant dense<0xFF800000> : vector<8xf32>
    %150 = vector.multi_reduction <maximumf>, %148, %cst_43 [1] : vector<8x16xf32> to vector<8xf32>
    %151 = vector.shape_cast %150 : vector<8xf32> to vector<8x1xf32>
    %152 = vector.broadcast %151 : vector<8x1xf32> to vector<8x16xf32>
    %153 = arith.subf %148, %152 : vector<8x16xf32>
    %154 = math.exp %153 : vector<8x16xf32>
    %cst_44 = arith.constant dense<0.000000e+00> : vector<8xf32>
    %155 = vector.multi_reduction <add>, %154, %cst_44 [1] : vector<8x16xf32> to vector<8xf32>
    %156 = vector.shape_cast %155 : vector<8xf32> to vector<8x1xf32>
    %157 = math.log %156 : vector<8x1xf32>
    %158 = vector.broadcast %157 : vector<8x1xf32> to vector<8x16xf32>
    %159 = arith.subf %153, %158 : vector<8x16xf32>
    %c0_45 = arith.constant 0 : index
    %c0_46 = arith.constant 0 : index
    %160 = vector.load %arg6[%c0_45, %c0_46] : memref<8x16xf32, #tpu.memory_space<vmem>>, vector<8x16xf32>
    tpu.vector_store %arg6[%c0_45, %c0_46], %159 {strides = array<i32>} : memref<8x16xf32, #tpu.memory_space<vmem>>, vector<8x16xf32>,
    return
  }
}

</mosaic_0001>

<bundles_post_ra>
// kernel: tpu_custom_call.1
= control target key start
LH: loop header
LB: loop body
LE: loop exit
PB: predicated region body
PF: predicated region fallthrough
CT: control target
= control target key end

     0   :  { %12 = vsyncpa [#allocation3], 0  ;;  %s1953_s0 = inlined_call_operand.hbm [shape: f32[8,8], index: 0, kind: input, shape index: {}]   ;;  %s1954_s1 = inlined_call_operand.hbm [shape: f32[8,8], index: 1, kind: input, shape index: {}]   ;;  %s1955_s2 = inlined_call_operand.hbm [shape: f32[8,32], index: 2, kind: input, shape index: {}]   ;;  %s1956_s3 = inlined_call_operand.hbm [shape: f32[16,32], index: 3, kind: input, shape index: {}]   ;;  %s1957_s4 = inlined_call_operand.vmem [shape: f32[1,128], index: 4, kind: input, shape index: {}]   ;;  %s1958_s5 = inlined_call_operand.hbm [shape: f32[8,16], index: 5, kind: output, shape index: {0}]   ;;  %s1959_s6 = inlined_call_operand.hbm [shape: f32[8,16], index: 6, kind: output, shape index: {1}]  }
   0x1   :  { %13 = vsyncpa [#allocation6], 0 }
   0x2   :  { %14 = vsyncpa [#allocation9], 0 }
   0x3   :  { %15 = vsyncpa [#allocation4], 0 }
   0x4   :  { %16 = vsyncpa [#allocation12], 0  ;;  %s1569_s21 = smov [#allocation5]   ;;  %s1570_s23 = smov [#allocation2]  }
   0x5   :  { %s33_s22 = sshll.u32 %s1569_s21, 4  ;;  %s23_s24 = sshll.u32 %s1570_s23, 4  ;;  %s34_s22 = int_to_ptr.vmem [resolvable:$true] %s33_s22  ;;  %s24_s24 = int_to_ptr.vmem [resolvable:$true] %s23_s24 }
   0x6   :  { %s1427_s27 = scalar_lea.hbm %s1954_s1, 128 }
   0x7   :  { %p1428_p0 = scmp.ne.s32.totalorder %s1954_s1, %s1427_s27  ;;  %p1431_p1 = scmp.lt.u32.totalorder %s1427_s27, %s1954_s1 }
   0x9   :  { %p1433_p2 = pnand %p1431_p1, %p1428_p0 }
   0xb   :  { %1436 = shalt.err (!%p1433_p2)
}
   0xc   :  { %s1437_s8 = scalar_lea.vmem %s34_s22, 128  ;;  %p1442_p4 = scmp.lt.s32.totalorder %s34_s22, %s34_s22 }
   0xd   :  { %p1438_p3 = scmp.ne.s32.totalorder %s34_s22, %s1437_s8  ;;  %p1443_p5 = scmp.lt.s32.totalorder %s1437_s8, %s1437_s8 }
   0xf   :  { %p1444_p6 = por %p1443_p5, %p1442_p4 }
  0x11   :  { %p1445_p7 = pnand %p1444_p6, %p1438_p3 }
  0x13   :  { %1448 = shalt.err (!%p1445_p7)
}
  0x14   :  { %36 = dma.hbm_to_vmem [thread:$0]  %s1954_s1, 128, %s34_s22, [#allocation6]  }
  0x15   :  { %s1449_s13 = scalar_lea.hbm %s1953_s0, 128 }
  0x16   :  { %p1450_p8 = scmp.ne.s32.totalorder %s1953_s0, %s1449_s13  ;;  %p1453_p9 = scmp.lt.u32.totalorder %s1449_s13, %s1953_s0 }
  0x18   :  { %p1455_p10 = pnand %p1453_p9, %p1450_p8 }
  0x1a   :  { %1458 = shalt.err (!%p1455_p10)
}
  0x1b   :  { %s1459_s18 = scalar_lea.vmem %s24_s24, 128  ;;  %p1464_p12 = scmp.lt.s32.totalorder %s24_s24, %s24_s24 }
  0x1c   :  { %p1460_p11 = scmp.ne.s32.totalorder %s24_s24, %s1459_s18  ;;  %p1465_p13 = scmp.lt.s32.totalorder %s1459_s18, %s1459_s18 }
  0x1e   :  { %p1466_p0 = por %p1465_p13, %p1464_p12 }
  0x20   :  { %p1467_p1 = pnand %p1466_p0, %p1460_p11 }
  0x22   :  { %1470 = shalt.err (!%p1467_p1)
}
  0x23   :  { %26 = dma.hbm_to_vmem [thread:$0]  %s1953_s0, 128, %s24_s24, [#allocation3]  }
  0x24   :  { %s1571_s20 = smov [#allocation7]   ;;  %s1572_s22 = smov [#allocation8]  }
  0x25   :  { %s43_s21 = sshll.u32 %s1571_s20, 4  ;;  %s52_s23 = sshll.u32 %s1572_s22, 4  ;;  %s44_s21 = int_to_ptr.vmem [resolvable:$true] %s43_s21  ;;  %s1648_s23 = int_to_ptr.vmem [resolvable:$true] %s52_s23 }
  0x26   :  { %s1471_s27 = scalar_lea.hbm %s1955_s2, 128 }
  0x27   :  { %p1472_p2 = scmp.ne.s32.totalorder %s1955_s2, %s1471_s27  ;;  %p1475_p3 = scmp.lt.u32.totalorder %s1471_s27, %s1955_s2 }
  0x29   :  { %p1477_p4 = pnand %p1475_p3, %p1472_p2 }
  0x2b   :  { %1480 = shalt.err (!%p1477_p4)
}
  0x2c   :  { %s1481_s0 = scalar_lea.vmem %s44_s21, 128  ;;  %p1486_p6 = scmp.lt.s32.totalorder %s44_s21, %s44_s21 }
  0x2d   :  { %p1482_p5 = scmp.ne.s32.totalorder %s44_s21, %s1481_s0  ;;  %p1487_p7 = scmp.lt.s32.totalorder %s1481_s0, %s1481_s0 }
  0x2f   :  { %p1488_p8 = por %p1487_p7, %p1486_p6 }
  0x31   :  { %p1489_p9 = pnand %p1488_p8, %p1482_p5 }
  0x33   :  { %1492 = shalt.err (!%p1489_p9)
}
  0x34   :  { %46 = dma.hbm_to_vmem [thread:$0]  %s1955_s2, 128, %s44_s21, [#allocation6]  }
  0x35   :  { %s1493_s11 = scalar_lea.hbm %s1956_s3, 256 }
  0x36   :  { %p1494_p10 = scmp.ne.s32.totalorder %s1956_s3, %s1493_s11  ;;  %p1497_p11 = scmp.lt.u32.totalorder %s1493_s11, %s1956_s3 }
  0x38   :  { %p1499_p12 = pnand %p1497_p11, %p1494_p10 }
  0x3a   :  { %1502 = shalt.err (!%p1499_p12)
}
  0x3b   :  { %s1503_s16 = scalar_lea.vmem %s1648_s23, 256  ;;  %p1508_p0 = scmp.lt.s32.totalorder %s1648_s23, %s1648_s23 }
  0x3c   :  { %p1504_p13 = scmp.ne.s32.totalorder %s1648_s23, %s1503_s16  ;;  %p1509_p1 = scmp.lt.s32.totalorder %s1503_s16, %s1503_s16 }
  0x3e   :  { %p1510_p2 = por %p1509_p1, %p1508_p0 }
  0x40   :  { %p1511_p3 = pnand %p1510_p2, %p1504_p13 }
  0x42   :  { %1514 = shalt.err (!%p1511_p3)
}
  0x43   :  { %s1573_s2 = smov 128   ;;  %s1574_s17 = smov 8  }
  0x44   :  { %58 = dma.hbm_to_vmem [thread:$0]  %s1956_s3, 256, %s1648_s23, [#allocation9], %s1573_s2, %s1573_s2, %s1574_s17  }
  0x45   :  { %1559 = dma.done.wait [#allocation3], 128  }
  0x46   :  { %1560 = vsyncadd [#allocation3], 4294967168 }
  0x47   :  { %1561 = dma.done.wait [#allocation6], 256  }
  0x48   :  { %1562 = vsyncadd [#allocation6], 4294967040 }
  0x49   :  { %1563 = dma.done.wait [#allocation9], 256  }
  0x4a   :  { %1564 = vsyncadd [#allocation9], 4294967040  ;;  %v1575_v0 = vmov 0.0   ;;  %vm1576_vm0 = vmmov 0   ;;  %vm84_vm1 = vcmask 64512   ;;  %v77_v1 = vld [vmem:[#allocation7] sm:$0xff]  ;;  %v163_v3 = vlaneseq }
  0x4b   :  { %1350 = vmatprep.subr.mxu0 %v1575_v0  ;;  %1352 = vmatprep.mubr.msk.f32.mxu0 %vm1576_vm0, %v1575_v0  ;;  %v76_v2 = vld [vmem:[#allocation2] sm:$0xff]  ;;  %s1577_s20 = smov 16   ;;  %s1578_s21 = smov 48   ;;  %v1579_v11 = vmov 1966171168   ;;  %vm392_vm10 = vcmask 1041409  }
  0x4c   :  { %1355 = vmatprep.subr.mxu1 %v1575_v0  ;;  %1357 = vmatprep.mubr.msk.f32.mxu1 %vm1576_vm0, %v1575_v0  ;;  %v164_v4 = vshrl.u32 %v163_v3, 7  ;;  %v359_v5 = vand.u32 127, %v163_v3  ;;  %v1695_v7 = vld [vmem:[%s1957_s4] ss:$0 sm:$0xff]  ;;  %v161_v12 = vunpack.c.l.s4 %v1579_v11  ;;  %s1580_s4 = smov 104   ;;  %s1581_s22 = smov 112  }
  0x4d   :  { %1351 = vmatpush3.msra.mxu0 %v77_v1  ;;  %vm394_vm11 = vcmask 1042434   ;;  %vm396_vm12 = vcmask 1043459   ;;  %vm398_vm13 = vcmask 1044484   ;;  %vm400_vm14 = vcmask 1045509   ;;  %s1582_s23 = smov 120   ;;  %s1583_s25 = smov 64  }
  0x4e   :  { %1353 = vmatmul.mubr.msk.f32.vlgmr.msra.gmra.mrb[0].mxu0 %vm84_vm1, %v76_v2  ;;  %1360 = vmatprep.subr.mxu0 %v1575_v0  ;;  %v1690_v6 = vsub.s32 %v359_v5, %v164_v4  ;;  %v162_v13 = vunpack.c.0.s8 %v161_v12  ;;  %v1714_v22 = vsub.s32 0, %v164_v4  ;;  %vm402_vm15 = vcmask 1046534   ;;  %s1585_s26 = smov 96   ;;  %s1586_s27 = smov 32  }
  0x4f   :  { %1362 = vmatprep.mubr.msk.f32.mxu0 %vm1576_vm0, %v1575_v0  ;;  %s1587_s28 = smov [#allocation10]  }
  0x50   :  { %v1704_v14 = vsub.s32 %v162_v13, %v164_v4  ;;  %s1304_s29 = sshll.u32 %s1587_s28, 4  ;;  %s1305_s29 = int_to_ptr.vmem [resolvable:$true] %s1304_s29 }
  0x51   :  { %s1515_s30 = scalar_lea.vmem %s1305_s29, 128  ;;  %p1520_p5 = scmp.lt.s32.totalorder %s1305_s29, %s1305_s29 }
  0x52   :  { %p1516_p4 = scmp.ne.s32.totalorder %s1305_s29, %s1515_s30  ;;  %p1521_p6 = scmp.lt.s32.totalorder %s1515_s30, %s1515_s30 }
  0x54   :  { %p1522_p7 = por %p1521_p6, %p1520_p5 }
  0x56   :  { %p1523_p8 = pnand %p1522_p7, %p1516_p4 }
 0x121   :  { %v154_v8 = vpop.f32.mrb[0].mxu0 }
 0x122   :  { %v1698_v9 = vadd.f32 %v1695_v7, %v154_v8  ;;  %v1354_v10 = vpop.f32.mrb[1].mxu0 }
 0x124   :  { %248 = vrot.lane.b32.xlu0 %v1698_v9, %s1577_s20  ;;  %1356 = vmatpush3.msra.mxu1 %v1698_v9  ;;  %v159_v15 = vcombine.high %v1698_v9, %v1698_v9  ;;  %v166_v16 = vrot.slane %v1698_v9, %v1704_v14 }
 0x126   :  { %v173_v17 = vrot.slane %v159_v15, %v1704_v14  ;;  %v174_v18 = vcombine.high %v166_v16, %v166_v16  ;;  %v182_v19 = vrot.slane %v166_v16, %v1704_v14 }
 0x128   :  { %283 = vrot.lane.b32.xlu0 %v1695_v7, %s1578_s21  ;;  %v196_v20 = vrot.slane %v174_v18, %v1704_v14  ;;  %v189_v21 = vrot.slane %v173_v17, %v1704_v14  ;;  %v204_v23 = vcombine.high %v182_v19, %v182_v19  ;;  %v175_v26 = vcombine.high %v173_v17, %v173_v17 }
 0x129   :  { %v211_v27 = vrot.slane %v182_v19, %v1714_v22 }
 0x12a   :  { %v206_v24 = vcombine.high %v196_v20, %v196_v20  ;;  %v205_v25 = vcombine.high %v189_v21, %v189_v21  ;;  %v219_v28 = vrot.slane %v204_v23, %v1714_v22  ;;  %v215_v29 = vrot.slane %v196_v20, %v1714_v22 }
 0x12b   :  { %v227_v30 = vrot.slane %v189_v21, %v1714_v22  ;;  %v203_v34 = vrot.slane %v175_v26, %v1704_v14 }
 0x12c   :  { %v223_v32 = vrot.slane %v206_v24, %v1714_v22  ;;  %v235_v33 = vrot.slane %v205_v25, %v1714_v22 }
 0x12d   :  { %v231_v48 = vrot.slane %v203_v34, %v1714_v22  ;;  %v207_v49 = vcombine.high %v203_v34, %v203_v34 }
 0x12f   :  { %v239_v57 = vrot.slane %v207_v49, %v1714_v22 }
 0x196   :  { %v249_v31 = vpop.permute.xlu0 %248 }
 0x197   :  { %v251_v35 = vadd.f32 %v249_v31, %v211_v27  ;;  %v253_v36 = vadd.f32 %v249_v31, %v219_v28  ;;  %v252_v37 = vadd.f32 %v249_v31, %v215_v29  ;;  %v255_v38 = vadd.f32 %v249_v31, %v227_v30 }
 0x198   :  { %v254_v39 = vadd.f32 %v249_v31, %v223_v32  ;;  %v257_v40 = vadd.f32 %v249_v31, %v235_v33  ;;  %v256_v55 = vadd.f32 %v249_v31, %v231_v48  ;;  %v258_v63 = vadd.f32 %v249_v31, %v239_v57 }
 0x199   :  { %vm259_vm2 = vcmp.gt.f32.partialorder %v251_v35, 0.0  ;;  %v267_v41 = vmul.f32 0.2, %v251_v35  ;;  %vm261_vm3 = vcmp.gt.f32.partialorder %v253_v36, 0.0  ;;  %v269_v42 = vmul.f32 0.2, %v253_v36 }
 0x19a   :  { %v1723_v43 = vpop.permute.xlu0 %283  ;;  %vm260_vm4 = vcmp.gt.f32.partialorder %v252_v37, 0.0  ;;  %v268_v44 = vmul.f32 0.2, %v252_v37  ;;  %vm263_vm5 = vcmp.gt.f32.partialorder %v255_v38, 0.0  ;;  %v271_v45 = vmul.f32 0.2, %v255_v38 }
 0x19b   :  { %v275_v46 = vsel %vm259_vm2, %v251_v35, %v267_v41  ;;  %v277_v47 = vsel %vm261_vm3, %v253_v36, %v269_v42  ;;  %v270_v54 = vmul.f32 0.2, %v254_v39  ;;  %vm262_vm6 = vcmp.gt.f32.partialorder %v254_v39, 0.0 }
 0x19c   :  { %v286_v50 = vmul.f32 %v1723_v43, %v275_v46  ;;  %v288_v51 = vmul.f32 %v1723_v43, %v277_v47  ;;  %v276_v52 = vsel %vm260_vm4, %v252_v37, %v268_v44  ;;  %v279_v53 = vsel %vm263_vm5, %v255_v38, %v271_v45 }
 0x19d   :  { %vm265_vm7 = vcmp.gt.f32.partialorder %v257_v40, 0.0  ;;  %v273_v56 = vmul.f32 0.2, %v257_v40  ;;  %v287_v58 = vmul.f32 %v1723_v43, %v276_v52  ;;  %v290_v59 = vmul.f32 %v1723_v43, %v279_v53 }
 0x19e   :  { %492 = vrot.lane.b32.xlu1 %v286_v50, %s1580_s4  ;;  %496 = vrot.lane.b32.xlu0 %v288_v51, %s1580_s4  ;;  %v278_v60 = vsel %vm262_vm6, %v254_v39, %v270_v54  ;;  %v272_v62 = vmul.f32 0.2, %v256_v55  ;;  %vm264_vm8 = vcmp.gt.f32.partialorder %v256_v55, 0.0  ;;  %v274_v4 = vmul.f32 0.2, %v258_v63 }
 0x19f   :  { %v281_v61 = vsel %vm265_vm7, %v257_v40, %v273_v56  ;;  %v289_v1 = vmul.f32 %v1723_v43, %v278_v60  ;;  %vm266_vm9 = vcmp.gt.f32.partialorder %v258_v63, 0.0  ;;  %vm404_vm2 = vcmask 1047559  }
 0x1a0   :  { %v292_v2 = vmul.f32 %v1723_v43, %v281_v61  ;;  %v280_v3 = vsel %vm264_vm8, %v256_v55, %v272_v62  ;;  %v282_v8 = vsel %vm266_vm9, %v258_v63, %v274_v4  ;;  %vm695_vm4 = vcmask 130048  }
 0x1a1   :  { %v291_v5 = vmul.f32 %v1723_v43, %v280_v3  ;;  %v293_v10 = vmul.f32 %v1723_v43, %v282_v8 }
 0x1a2   :  { %494 = vrot.lane.b32.xlu1 %v287_v58, %s1580_s4  ;;  %500 = vrot.lane.b32.xlu0 %v290_v59, %s1580_s4 }
 0x1a6   :  { %498 = vrot.lane.b32.xlu1 %v289_v1, %s1580_s4  ;;  %504 = vrot.lane.b32.xlu0 %v292_v2, %s1580_s4 }
 0x1aa   :  { %302 = vrot.lane.b32.xlu0 %v286_v50, %s1581_s22  ;;  %502 = vrot.lane.b32.xlu1 %v291_v5, %s1580_s4 }
 0x1ae   :  { %306 = vrot.lane.b32.xlu0 %v288_v51, %s1581_s22  ;;  %506 = vrot.lane.b32.xlu1 %v293_v10, %s1580_s4 }
 0x1b2   :  { %308 = vrot.lane.b32.xlu0 %v289_v1, %s1581_s22  ;;  %304 = vrot.lane.b32.xlu1 %v287_v58, %s1581_s22  ;;  %v1778_v1 = vld [vmem:[#allocation5] sm:$0xff] }
 0x1b3   :  { %vm74_vm3 = vcmp.gt.f32.partialorder %v1778_v1, 0.5 }
 0x1b6   :  { %314 = vrot.lane.b32.xlu0 %v292_v2, %s1581_s22  ;;  %310 = vrot.lane.b32.xlu1 %v290_v59, %s1581_s22 }
 0x1ba   :  { %312 = vrot.lane.b32.xlu1 %v291_v5, %s1581_s22 }
 0x1be   :  { %316 = vrot.lane.b32.xlu1 %v293_v10, %s1581_s22 }
 0x210   :  { %v493_v11 = vpop.permute.xlu1 %492  ;;  %v497_v12 = vpop.permute.xlu0 %496 }
 0x211   :  { %v516_v13 = vsel %vm84_vm1, %v493_v11, 0.0  ;;  %v522_v18 = vsel %vm84_vm1, %v497_v12, 0.0 }
 0x212   :  { %517 = vadd.xlane.f32.xlu1 %v516_v13 }
 0x214   :  { %v495_v15 = vpop.permute.xlu1 %494  ;;  %v501_v16 = vpop.permute.xlu0 %500 }
 0x215   :  { %v519_v17 = vsel %vm84_vm1, %v495_v15, 0.0  ;;  %v528_v23 = vsel %vm84_vm1, %v501_v16, 0.0 }
 0x216   :  { %520 = vadd.xlane.f32.xlu0 %v519_v17  ;;  %523 = vadd.xlane.f32.xlu1 %v522_v18 }
 0x218   :  { %v499_v19 = vpop.permute.xlu1 %498  ;;  %v505_v20 = vpop.permute.xlu0 %504 }
 0x219   :  { %v525_v21 = vsel %vm84_vm1, %v499_v19, 0.0  ;;  %v534_v26 = vsel %vm84_vm1, %v505_v20, 0.0 }
 0x21a   :  { %526 = vadd.xlane.f32.xlu0 %v525_v21  ;;  %529 = vadd.xlane.f32.xlu1 %v528_v23 }
 0x21c   :  { %v303_v24 = vpop.permute.xlu0 %302  ;;  %v503_v25 = vpop.permute.xlu1 %502 }
 0x21d   :  { %v531_v27 = vsel %vm84_vm1, %v503_v25, 0.0  ;;  %v326_v30 = vsel %vm84_vm1, %v303_v24, 0.0 }
 0x21e   :  { %535 = vadd.xlane.f32.xlu0 %v534_v26  ;;  %532 = vadd.xlane.f32.xlu1 %v531_v27 }
 0x220   :  { %v307_v28 = vpop.permute.xlu0 %306  ;;  %v507_v29 = vpop.permute.xlu1 %506 }
 0x221   :  { %v537_v31 = vsel %vm84_vm1, %v507_v29, 0.0  ;;  %v332_v36 = vsel %vm84_vm1, %v307_v28, 0.0 }
 0x222   :  { %327 = vadd.xlane.f32.xlu0 %v326_v30  ;;  %538 = vadd.xlane.f32.xlu1 %v537_v31 }
 0x224   :  { %v309_v32 = vpop.permute.xlu0 %308  ;;  %v305_v33 = vpop.permute.xlu1 %304 }
 0x225   :  { %v329_v34 = vsel %vm84_vm1, %v305_v33, 0.0  ;;  %v335_v40 = vsel %vm84_vm1, %v309_v32, 0.0 }
 0x226   :  { %330 = vadd.xlane.f32.xlu0 %v329_v34 }
 0x228   :  { %v311_v35 = vpop.permute.xlu1 %310  ;;  %v315_v38 = vpop.permute.xlu0 %314 }
 0x229   :  { %v338_v37 = vsel %vm84_vm1, %v311_v35, 0.0  ;;  %v344_v41 = vsel %vm84_vm1, %v315_v38, 0.0 }
 0x22a   :  { %333 = vadd.xlane.f32.xlu0 %v332_v36  ;;  %339 = vadd.xlane.f32.xlu1 %v338_v37 }
 0x22c   :  { %v313_v39 = vpop.permute.xlu1 %312 }
 0x22d   :  { %v341_v42 = vsel %vm84_vm1, %v313_v39, 0.0 }
 0x22e   :  { %336 = vadd.xlane.f32.xlu0 %v335_v40  ;;  %345 = vadd.xlane.f32.xlu1 %v344_v41 }
 0x230   :  { %v317_v44 = vpop.permute.xlu1 %316 }
 0x231   :  { %v347_v45 = vsel %vm84_vm1, %v317_v44, 0.0 }
 0x232   :  { %342 = vadd.xlane.f32.xlu0 %v341_v42 }
 0x236   :  { %348 = vadd.xlane.f32.xlu0 %v347_v45 }
 0x29f   :  { %v518_v46 = vpop.xlane.xlu1 %517 }
 0x2a0   :  { %v551_v49 = vrot.slane %v518_v46, %v1690_v6 }
 0x2a3   :  { %v521_v47 = vpop.xlane.xlu0 %520  ;;  %v524_v48 = vpop.xlane.xlu1 %523 }
 0x2a4   :  { %v555_v50 = vrot.slane %v521_v47, %v1690_v6  ;;  %v559_v51 = vrot.slane %v524_v48, %v1690_v6 }
 0x2a6   :  { %v580_v52 = vsel %vm392_vm10, %v555_v50, %v551_v49 }
 0x2a7   :  { %v527_v53 = vpop.xlane.xlu0 %526  ;;  %v530_v54 = vpop.xlane.xlu1 %529  ;;  %v581_v56 = vsel %vm394_vm11, %v559_v51, %v580_v52 }
 0x2a8   :  { %v563_v55 = vrot.slane %v527_v53, %v1690_v6  ;;  %v567_v57 = vrot.slane %v530_v54, %v1690_v6 }
 0x2aa   :  { %v582_v58 = vsel %vm396_vm12, %v563_v55, %v581_v56 }
 0x2ab   :  { %v536_v59 = vpop.xlane.xlu0 %535  ;;  %v533_v60 = vpop.xlane.xlu1 %532  ;;  %v583_v62 = vsel %vm398_vm13, %v567_v57, %v582_v58  ;;  %v690_v58 = vld [vmem:[#allocation8] sm:$0xff] }
 0x2ac   :  { %v571_v61 = vrot.slane %v533_v60, %v1690_v6  ;;  %v575_v63 = vrot.slane %v536_v59, %v1690_v6  ;;  %v691_v59 = vld [vmem:[#allocation8 + $0x8] sm:$0xff]  ;;  %v1584_v60 = vmov 0.0|0.0  }
 0x2ad   :  { %1382 = vmatprep.subr.bf16.mxu1 %v1584_v60 }
 0x2ae   :  { %v584_v2 = vsel %vm400_vm14, %v571_v61, %v583_v62  ;;  %v1383_v61 = vpack.c.bf16 %v691_v59, %v690_v58 }
 0x2af   :  { %v328_v3 = vpop.xlane.xlu0 %327  ;;  %v539_v4 = vpop.xlane.xlu1 %538  ;;  %v585_v8 = vsel %vm402_vm15, %v575_v63, %v584_v2 }
 0x2b0   :  { %v579_v5 = vrot.slane %v539_v4, %v1690_v6  ;;  %v363_v18 = vrot.slane %v328_v3, %v1690_v6 }
 0x2b2   :  { %v586_v10 = vsel %vm404_vm2, %v579_v5, %v585_v8 }
 0x2b3   :  { %v331_v11 = vpop.xlane.xlu0 %330  ;;  %v588_v12 = vsel %vm74_vm3, %v586_v10, -1e+30 }
 0x2b4   :  { %v589_v13 = vsel %vm84_vm1, %v588_v12, -inf  ;;  %v367_v16 = vrot.slane %v331_v11, %v1690_v6 }
 0x2b5   :  { %590 = vmax.xlane.f32.xlu1 %v589_v13 }
 0x2b6   :  { %v393_v21 = vsel %vm392_vm10, %v367_v16, %v363_v18 }
 0x2b7   :  { %v334_v15 = vpop.xlane.xlu0 %333  ;;  %v340_v19 = vpop.xlane.xlu1 %339 }
 0x2b8   :  { %v371_v17 = vrot.slane %v334_v15, %v1690_v6  ;;  %v379_v26 = vrot.slane %v340_v19, %v1690_v6 }
 0x2ba   :  { %v395_v24 = vsel %vm394_vm11, %v371_v17, %v393_v21 }
 0x2bb   :  { %v337_v20 = vpop.xlane.xlu0 %336  ;;  %v346_v28 = vpop.xlane.xlu1 %345 }
 0x2bc   :  { %v375_v23 = vrot.slane %v337_v20, %v1690_v6  ;;  %v387_v32 = vrot.slane %v346_v28, %v1690_v6 }
 0x2be   :  { %v397_v25 = vsel %vm396_vm12, %v375_v23, %v395_v24 }
 0x2bf   :  { %v343_v27 = vpop.xlane.xlu0 %342  ;;  %v399_v30 = vsel %vm398_vm13, %v379_v26, %v397_v25 }
 0x2c0   :  { %v383_v29 = vrot.slane %v343_v27, %v1690_v6 }
 0x2c2   :  { %v401_v31 = vsel %vm400_vm14, %v383_v29, %v399_v30 }
 0x2c3   :  { %v349_v33 = vpop.xlane.xlu0 %348  ;;  %v403_v35 = vsel %vm402_vm15, %v387_v32, %v401_v31 }
 0x2c4   :  { %v391_v34 = vrot.slane %v349_v33, %v1690_v6 }
 0x2c6   :  { %v405_v36 = vsel %vm404_vm2, %v391_v34, %v403_v35 }
 0x2c7   :  { %v407_v37 = vsel %vm74_vm3, %v405_v36, -1e+30 }
 0x2c8   :  { %v408_v38 = vsel %vm84_vm1, %v407_v37, -inf }
 0x2c9   :  { %409 = vmax.xlane.f32.xlu0 %v408_v38 }
 0x2df   :  { %600 = vrot.lane.b32.xlu0 %v1698_v9, %s1582_s23 }
 0x2e3   :  { %681 = vrot.lane.b32.xlu0 %v1695_v7, %s1583_s25 }
 0x342   :  { %v591_v39 = vpop.xlane.xlu1 %590 }
 0x343   :  { %v592_v40 = vsub.f32 %v588_v12, %v591_v39 }
 0x345   :  { %v593_v41 = vmul.f32 1.442695, %v592_v40 }
 0x347   :  { %1405 = vpow2.f32 %v593_v41 }
 0x351   :  { %v1406_v42 = vpop.eup %1405 }
 0x352   :  { %v595_v44 = vsel %vm84_vm1, %v1406_v42, 0.0 }
 0x353   :  { %596 = vadd.xlane.f32.xlu1 %v595_v44 }
 0x356   :  { %v410_v45 = vpop.xlane.xlu0 %409 }
 0x357   :  { %v411_v46 = vsub.f32 %v407_v37, %v410_v45 }
 0x359   :  { %v412_v47 = vmul.f32 1.442695, %v411_v46 }
 0x35a   :  { %v601_v48 = vpop.permute.xlu0 %600 }
 0x35b   :  { %1407 = vpow2.f32 %v412_v47  ;;  %1361 = vmatpush3.msra.mxu0 %v601_v48 }
 0x35c   :  { %1372 = vmatprep.subr.mxu0 %v1575_v0 }
 0x35e   :  { %v682_v2 = vpop.permute.xlu0 %681 }
 0x365   :  { %v1408_v49 = vpop.eup %1407 }
 0x366   :  { %v414_v50 = vsel %vm84_vm1, %v1408_v49, 0.0 }
 0x367   :  { %415 = vadd.xlane.f32.xlu1 %v414_v50 }
 0x3e0   :  { %v597_v9 = vpop.xlane.xlu1 %596 }
 0x3e1   :  { %1409 = vrcp.f32 %v597_v9 }
 0x3eb   :  { %v1410_v51 = vpop.eup %1409 }
 0x3ec   :  { %v599_v52 = vmul.f32 %v1410_v51, %v1406_v42 }
 0x3ee   :  { %1363 = vmatmul.mubr.msk.f32.vlgmr.msra.gmra.mrb[2].mxu0 %vm84_vm1, %v599_v52 }
 0x3ef   :  { %1374 = vmatprep.mubr.msk.f32.mxu0 %vm1576_vm0, %v1575_v0 }
 0x3f4   :  { %v416_v53 = vpop.xlane.xlu1 %415 }
 0x3f5   :  { %1411 = vrcp.f32 %v416_v53 }
 0x3ff   :  { %v1412_v54 = vpop.eup %1411 }
 0x400   :  { %v418_v55 = vmul.f32 %v1412_v54, %v1408_v49 }
 0x402   :  { %1358 = vmatmul.mubr.msk.f32.vlgmr.msra.gmra.mrb[0].mxu1 %vm84_vm1, %v418_v55 }
 0x403   :  { %1369 = vmatprep.mubr.msk.f32.mxu1 %vm1576_vm0, %v1575_v0  ;;  %1384 = vmatpush3.bf16.msra.mxu1 %v1383_v61 }
 0x404   :  { %1377 = vmatprep.subr.mxu1 %v1575_v0 }
 0x4c1   :  { %v672_v56 = vpop.f32.mrb[2].mxu0 }
 0x4c2   :  { %677 = vrot.lane.b32.xlu1 %v672_v56, %s1574_s17  ;;  %v1364_v57 = vpop.f32.mrb[3].mxu0 }
 0x4c6   :  { %692 = vrot.lane.b32.xlu1 %v1695_v7, %s1585_s26 }
 0x4ca   :  { %894 = vrot.lane.b32.xlu1 %v1695_v7, %s1586_s27 }
 0x4d5   :  { %v488_v62 = vpop.f32.mrb[0].mxu1 }
 0x4d6   :  { %v1359_v63 = vpop.f32.mrb[1].mxu1 }
 0x534   :  { %v678_v3 = vpop.permute.xlu1 %677 }
 0x535   :  { %v680_v4 = vsel %vm84_vm1, %v488_v62, %v678_v3 }
 0x536   :  { %v684_v5 = vadd.f32 %v682_v2, %v680_v4 }
 0x538   :  { %v686_v8 = vmul.f32 1.442695, %v684_v5  ;;  %vm685_vm5 = vcmp.gt.f32.partialorder %v684_v5, 0.0  ;;  %v693_v13 = vpop.permute.xlu1 %692 }
 0x53a   :  { %1413 = vpow2.f32 %v686_v8 }
 0x53c   :  { %v895_v44 = vpop.permute.xlu1 %894 }
 0x544   :  { %v1414_v10 = vpop.eup %1413 }
 0x545   :  { %v1333_v11 = vadd.f32 -1.0, %v1414_v10 }
 0x547   :  { %v689_v12 = vsel %vm685_vm5, %v684_v5, %v1333_v11 }
 0x548   :  { %1370 = vmatmul.mubr.msk.f32.vlgmr.msra.gmra.mrb[2].mxu1 %vm695_vm4, %v689_v12 }
 0x549   :  { %1379 = vmatprep.mubr.msk.f32.mxu1 %vm1576_vm0, %v1575_v0 }
 0x61b   :  { %v765_v15 = vpop.f32.mrb[2].mxu1 }
 0x61c   :  { %v1826_v16 = vadd.f32 %v765_v15, %v693_v13  ;;  %v1371_v17 = vpop.f32.mrb[3].mxu1 }
 0x61e   :  { %859 = vrot.lane.b32.xlu0 %v1826_v16, %s1577_s20  ;;  %1373 = vmatpush3.msra.mxu0 %v1826_v16  ;;  %v777_v18 = vrot.slane %v1826_v16, %v1704_v14  ;;  %v770_v19 = vcombine.high %v1826_v16, %v1826_v16 }
 0x620   :  { %v785_v0 = vcombine.high %v777_v18, %v777_v18  ;;  %v784_v20 = vrot.slane %v770_v19, %v1704_v14  ;;  %v793_v7 = vrot.slane %v777_v18, %v1704_v14 }
 0x622   :  { %v807_v21 = vrot.slane %v785_v0, %v1704_v14  ;;  %v786_v23 = vcombine.high %v784_v20, %v784_v20  ;;  %v800_v24 = vrot.slane %v784_v20, %v1704_v14  ;;  %v815_v25 = vcombine.high %v793_v7, %v793_v7 }
 0x623   :  { %v822_v29 = vrot.slane %v793_v7, %v1714_v22 }
 0x624   :  { %v817_v26 = vcombine.high %v807_v21, %v807_v21  ;;  %v814_v27 = vrot.slane %v786_v23, %v1704_v14  ;;  %v816_v28 = vcombine.high %v800_v24, %v800_v24  ;;  %v826_v30 = vrot.slane %v807_v21, %v1714_v22 }
 0x625   :  { %v830_v31 = vrot.slane %v815_v25, %v1714_v22  ;;  %v838_v34 = vrot.slane %v800_v24, %v1714_v22 }
 0x626   :  { %v834_v32 = vrot.slane %v817_v26, %v1714_v22  ;;  %v842_v35 = vrot.slane %v814_v27, %v1714_v22  ;;  %v818_v36 = vcombine.high %v814_v27, %v814_v27  ;;  %v846_v42 = vrot.slane %v816_v28, %v1714_v22 }
 0x628   :  { %v850_v9 = vrot.slane %v818_v36, %v1714_v22 }
 0x690   :  { %v860_v33 = vpop.permute.xlu0 %859 }
 0x691   :  { %v862_v37 = vadd.f32 %v860_v33, %v822_v29  ;;  %v863_v38 = vadd.f32 %v860_v33, %v826_v30  ;;  %v864_v39 = vadd.f32 %v860_v33, %v830_v31  ;;  %v865_v40 = vadd.f32 %v860_v33, %v834_v32 }
 0x692   :  { %v866_v14 = vadd.f32 %v860_v33, %v838_v34  ;;  %v867_v41 = vadd.f32 %v860_v33, %v842_v35  ;;  %v868_v53 = vadd.f32 %v860_v33, %v846_v42  ;;  %v869_v57 = vadd.f32 %v860_v33, %v850_v9 }
 0x693   :  { %vm870_vm0 = vcmp.gt.f32.partialorder %v862_v37, 0.0  ;;  %v878_v45 = vmul.f32 0.2, %v862_v37  ;;  %vm871_vm6 = vcmp.gt.f32.partialorder %v863_v38, 0.0  ;;  %v879_v46 = vmul.f32 0.2, %v863_v38 }
 0x694   :  { %vm872_vm7 = vcmp.gt.f32.partialorder %v864_v39, 0.0  ;;  %v880_v47 = vmul.f32 0.2, %v864_v39  ;;  %vm873_vm8 = vcmp.gt.f32.partialorder %v865_v40, 0.0  ;;  %v881_v48 = vmul.f32 0.2, %v865_v40 }
 0x695   :  { %v886_v49 = vsel %vm870_vm0, %v862_v37, %v878_v45  ;;  %v887_v50 = vsel %vm871_vm6, %v863_v38, %v879_v46  ;;  %v882_v56 = vmul.f32 0.2, %v866_v14  ;;  %vm874_vm9 = vcmp.gt.f32.partialorder %v866_v14, 0.0 }
 0x696   :  { %v897_v51 = vmul.f32 %v895_v44, %v886_v49  ;;  %v898_v52 = vmul.f32 %v895_v44, %v887_v50  ;;  %v888_v54 = vsel %vm872_vm7, %v864_v39, %v880_v47  ;;  %v889_v55 = vsel %vm873_vm8, %v865_v40, %v881_v48 }
 0x697   :  { %vm875_vm5 = vcmp.gt.f32.partialorder %v867_v41, 0.0  ;;  %v883_v58 = vmul.f32 0.2, %v867_v41  ;;  %v899_v59 = vmul.f32 %v895_v44, %v888_v54  ;;  %v900_v60 = vmul.f32 %v895_v44, %v889_v55 }
 0x698   :  { %1094 = vrot.lane.b32.xlu0 %v897_v51, %s1580_s4  ;;  %1096 = vrot.lane.b32.xlu1 %v898_v52, %s1580_s4  ;;  %v890_v61 = vsel %vm874_vm9, %v866_v14, %v882_v56  ;;  %v884_v63 = vmul.f32 0.2, %v868_v53  ;;  %v885_v22 = vmul.f32 0.2, %v869_v57  ;;  %vm876_vm0 = vcmp.gt.f32.partialorder %v868_v53, 0.0 }
 0x699   :  { %v891_v62 = vsel %vm875_vm5, %v867_v41, %v883_v58  ;;  %vm877_vm6 = vcmp.gt.f32.partialorder %v869_v57, 0.0  ;;  %v901_v2 = vmul.f32 %v895_v44, %v890_v61 }
 0x69a   :  { %v902_v3 = vmul.f32 %v895_v44, %v891_v62  ;;  %v892_v4 = vsel %vm876_vm0, %v868_v53, %v884_v63  ;;  %v893_v5 = vsel %vm877_vm6, %v869_v57, %v885_v22 }
 0x69b   :  { %v903_v8 = vmul.f32 %v895_v44, %v892_v4  ;;  %v904_v10 = vmul.f32 %v895_v44, %v893_v5 }
 0x69c   :  { %1098 = vrot.lane.b32.xlu0 %v899_v59, %s1580_s4  ;;  %1100 = vrot.lane.b32.xlu1 %v900_v60, %s1580_s4 }
 0x6a0   :  { %1102 = vrot.lane.b32.xlu0 %v901_v2, %s1580_s4  ;;  %1104 = vrot.lane.b32.xlu1 %v902_v3, %s1580_s4 }
 0x6a4   :  { %1106 = vrot.lane.b32.xlu0 %v903_v8, %s1580_s4  ;;  %1108 = vrot.lane.b32.xlu1 %v904_v10, %s1580_s4 }
 0x6a8   :  { %913 = vrot.lane.b32.xlu0 %v897_v51, %s1581_s22  ;;  %915 = vrot.lane.b32.xlu1 %v898_v52, %s1581_s22 }
 0x6ac   :  { %917 = vrot.lane.b32.xlu0 %v899_v59, %s1581_s22  ;;  %921 = vrot.lane.b32.xlu1 %v901_v2, %s1581_s22 }
 0x6b0   :  { %919 = vrot.lane.b32.xlu0 %v900_v60, %s1581_s22  ;;  %923 = vrot.lane.b32.xlu1 %v902_v3, %s1581_s22 }
 0x6b4   :  { %925 = vrot.lane.b32.xlu0 %v903_v8, %s1581_s22  ;;  %927 = vrot.lane.b32.xlu1 %v904_v10, %s1581_s22 }
 0x70a   :  { %v1095_v11 = vpop.permute.xlu0 %1094  ;;  %v1097_v12 = vpop.permute.xlu1 %1096 }
 0x70b   :  { %v1121_v13 = vsel %vm84_vm1, %v1097_v12, 0.0  ;;  %v1118_v15 = vsel %vm84_vm1, %v1095_v11, 0.0 }
 0x70c   :  { %1122 = vadd.xlane.f32.xlu0 %v1121_v13  ;;  %1119 = vadd.xlane.f32.xlu1 %v1118_v15 }
 0x70e   :  { %v1099_v17 = vpop.permute.xlu0 %1098  ;;  %v1101_v18 = vpop.permute.xlu1 %1100 }
 0x70f   :  { %v1127_v19 = vsel %vm84_vm1, %v1101_v18, 0.0  ;;  %v1124_v0 = vsel %vm84_vm1, %v1099_v17, 0.0 }
 0x710   :  { %1128 = vadd.xlane.f32.xlu0 %v1127_v19  ;;  %1125 = vadd.xlane.f32.xlu1 %v1124_v0 }
 0x712   :  { %v1103_v20 = vpop.permute.xlu0 %1102  ;;  %v1105_v7 = vpop.permute.xlu1 %1104 }
 0x713   :  { %v1130_v21 = vsel %vm84_vm1, %v1103_v20, 0.0  ;;  %v1133_v26 = vsel %vm84_vm1, %v1105_v7, 0.0 }
 0x714   :  { %1131 = vadd.xlane.f32.xlu1 %v1130_v21 }
 0x716   :  { %v1107_v23 = vpop.permute.xlu0 %1106  ;;  %v1109_v24 = vpop.permute.xlu1 %1108 }
 0x717   :  { %v1136_v25 = vsel %vm84_vm1, %v1107_v23, 0.0  ;;  %v1139_v30 = vsel %vm84_vm1, %v1109_v24, 0.0 }
 0x718   :  { %1137 = vadd.xlane.f32.xlu0 %v1136_v25  ;;  %1134 = vadd.xlane.f32.xlu1 %v1133_v26 }
 0x71a   :  { %v914_v27 = vpop.permute.xlu0 %913  ;;  %v916_v28 = vpop.permute.xlu1 %915 }
 0x71b   :  { %v937_v29 = vsel %vm84_vm1, %v914_v27, 0.0  ;;  %v940_v33 = vsel %vm84_vm1, %v916_v28, 0.0 }
 0x71c   :  { %938 = vadd.xlane.f32.xlu0 %v937_v29  ;;  %1140 = vadd.xlane.f32.xlu1 %v1139_v30 }
 0x71e   :  { %v918_v31 = vpop.permute.xlu0 %917  ;;  %v922_v32 = vpop.permute.xlu1 %921 }
 0x71f   :  { %v949_v34 = vsel %vm84_vm1, %v922_v32, 0.0  ;;  %v943_v36 = vsel %vm84_vm1, %v918_v31, 0.0 }
 0x720   :  { %941 = vadd.xlane.f32.xlu0 %v940_v33  ;;  %950 = vadd.xlane.f32.xlu1 %v949_v34 }
 0x722   :  { %v920_v35 = vpop.permute.xlu0 %919  ;;  %v924_v37 = vpop.permute.xlu1 %923 }
 0x723   :  { %v946_v39 = vsel %vm84_vm1, %v920_v35, 0.0  ;;  %v952_v14 = vsel %vm84_vm1, %v924_v37, 0.0 }
 0x724   :  { %944 = vadd.xlane.f32.xlu0 %v943_v36 }
 0x726   :  { %v926_v38 = vpop.permute.xlu0 %925  ;;  %v928_v41 = vpop.permute.xlu1 %927 }
 0x727   :  { %v955_v40 = vsel %vm84_vm1, %v926_v38, 0.0  ;;  %v958_v42 = vsel %vm84_vm1, %v928_v41, 0.0 }
 0x728   :  { %947 = vadd.xlane.f32.xlu0 %v946_v39  ;;  %956 = vadd.xlane.f32.xlu1 %v955_v40 }
 0x72c   :  { %953 = vadd.xlane.f32.xlu0 %v952_v14 }
 0x730   :  { %959 = vadd.xlane.f32.xlu0 %v958_v42 }
 0x799   :  { %v1123_v44 = vpop.xlane.xlu0 %1122  ;;  %v1120_v45 = vpop.xlane.xlu1 %1119 }
 0x79a   :  { %v1157_v47 = vrot.slane %v1123_v44, %v1690_v6  ;;  %v1153_v48 = vrot.slane %v1120_v45, %v1690_v6 }
 0x79c   :  { %v1182_v51 = vsel %vm392_vm10, %v1157_v47, %v1153_v48 }
 0x79d   :  { %v1126_v46 = vpop.xlane.xlu1 %1125  ;;  %v1129_v49 = vpop.xlane.xlu0 %1128 }
 0x79e   :  { %v1161_v50 = vrot.slane %v1126_v46, %v1690_v6  ;;  %v1165_v52 = vrot.slane %v1129_v49, %v1690_v6 }
 0x7a0   :  { %v1183_v53 = vsel %vm394_vm11, %v1161_v50, %v1182_v51 }
 0x7a1   :  { %v1132_v9 = vpop.xlane.xlu1 %1131  ;;  %v1184_v57 = vsel %vm396_vm12, %v1165_v52, %v1183_v53 }
 0x7a2   :  { %v1169_v54 = vrot.slane %v1132_v9, %v1690_v6 }
 0x7a4   :  { %v1185_v59 = vsel %vm398_vm13, %v1169_v54, %v1184_v57 }
 0x7a5   :  { %v1138_v55 = vpop.xlane.xlu0 %1137  ;;  %v1135_v56 = vpop.xlane.xlu1 %1134 }
 0x7a6   :  { %v1173_v58 = vrot.slane %v1135_v56, %v1690_v6  ;;  %v1177_v60 = vrot.slane %v1138_v55, %v1690_v6 }
 0x7a8   :  { %v1186_v61 = vsel %vm400_vm14, %v1173_v58, %v1185_v59 }
 0x7a9   :  { %v939_v62 = vpop.xlane.xlu0 %938  ;;  %v1141_v63 = vpop.xlane.xlu1 %1140  ;;  %v1187_v2 = vsel %vm402_vm15, %v1177_v60, %v1186_v61 }
 0x7aa   :  { %v1181_v22 = vrot.slane %v1141_v63, %v1690_v6  ;;  %v972_v13 = vrot.slane %v939_v62, %v1690_v6 }
 0x7ac   :  { %v1188_v3 = vsel %vm404_vm2, %v1181_v22, %v1187_v2 }
 0x7ad   :  { %v942_v4 = vpop.xlane.xlu0 %941  ;;  %v1190_v5 = vsel %vm74_vm3, %v1188_v3, -1e+30  ;;  %v951_v18 = vpop.xlane.xlu1 %950 }
 0x7ae   :  { %v1191_v8 = vsel %vm84_vm1, %v1190_v5, -inf  ;;  %v976_v11 = vrot.slane %v942_v4, %v1690_v6  ;;  %v988_v7 = vrot.slane %v951_v18, %v1690_v6 }
 0x7af   :  { %1192 = vmax.xlane.f32.xlu1 %v1191_v8 }
 0x7b0   :  { %v1001_v17 = vsel %vm392_vm10, %v976_v11, %v972_v13 }
 0x7b1   :  { %v945_v10 = vpop.xlane.xlu0 %944 }
 0x7b2   :  { %v980_v12 = vrot.slane %v945_v10, %v1690_v6 }
 0x7b4   :  { %v1002_v0 = vsel %vm394_vm11, %v980_v12, %v1001_v17 }
 0x7b5   :  { %v948_v15 = vpop.xlane.xlu0 %947  ;;  %v957_v23 = vpop.xlane.xlu1 %956 }
 0x7b6   :  { %v984_v19 = vrot.slane %v948_v15, %v1690_v6  ;;  %v996_v27 = vrot.slane %v957_v23, %v1690_v6 }
 0x7b8   :  { %v1003_v20 = vsel %vm396_vm12, %v984_v19, %v1002_v0 }
 0x7b9   :  { %v954_v21 = vpop.xlane.xlu0 %953  ;;  %v1004_v25 = vsel %vm398_vm13, %v988_v7, %v1003_v20 }
 0x7ba   :  { %v992_v24 = vrot.slane %v954_v21, %v1690_v6 }
 0x7bc   :  { %v1005_v26 = vsel %vm400_vm14, %v992_v24, %v1004_v25 }
 0x7bd   :  { %v960_v28 = vpop.xlane.xlu0 %959  ;;  %v1006_v30 = vsel %vm402_vm15, %v996_v27, %v1005_v26 }
 0x7be   :  { %v1000_v29 = vrot.slane %v960_v28, %v1690_v6 }
 0x7c0   :  { %v1007_v31 = vsel %vm404_vm2, %v1000_v29, %v1006_v30 }
 0x7c1   :  { %v1009_v32 = vsel %vm74_vm3, %v1007_v31, -1e+30 }
 0x7c2   :  { %v1010_v33 = vsel %vm84_vm1, %v1009_v32, -inf }
 0x7c3   :  { %1011 = vmax.xlane.f32.xlu0 %v1010_v33 }
 0x7d9   :  { %1202 = vrot.lane.b32.xlu0 %v1826_v16, %s1582_s23 }
 0x83c   :  { %v1193_v34 = vpop.xlane.xlu1 %1192 }
 0x83d   :  { %v1194_v35 = vsub.f32 %v1190_v5, %v1193_v34 }
 0x83f   :  { %v1195_v36 = vmul.f32 1.442695, %v1194_v35 }
 0x841   :  { %1415 = vpow2.f32 %v1195_v36 }
 0x84b   :  { %v1416_v37 = vpop.eup %1415 }
 0x84c   :  { %v1197_v6 = vsel %vm84_vm1, %v1416_v37, 0.0 }
 0x84d   :  { %1198 = vadd.xlane.f32.xlu1 %v1197_v6 }
 0x850   :  { %v1012_v38 = vpop.xlane.xlu0 %1011 }
 0x851   :  { %v1013_v39 = vsub.f32 %v1009_v32, %v1012_v38 }
 0x853   :  { %v1014_v40 = vmul.f32 1.442695, %v1013_v39 }
 0x854   :  { %v1203_v14 = vpop.permute.xlu0 %1202 }
 0x855   :  { %1417 = vpow2.f32 %v1014_v40  ;;  %1378 = vmatpush3.msra.mxu1 %v1203_v14 }
 0x85f   :  { %v1418_v1 = vpop.eup %1417 }
 0x860   :  { %v1016_v41 = vsel %vm84_vm1, %v1418_v1, 0.0 }
 0x861   :  { %1017 = vadd.xlane.f32.xlu1 %v1016_v41 }
 0x8da   :  { %v1199_v42 = vpop.xlane.xlu1 %1198 }
 0x8db   :  { %1419 = vrcp.f32 %v1199_v42 }
 0x8e5   :  { %v1420_v16 = vpop.eup %1419 }
 0x8e6   :  { %v1201_v44 = vmul.f32 %v1420_v16, %v1416_v37 }
 0x8e8   :  { %1380 = vmatmul.mubr.msk.f32.vlgmr.msra.gmra.mrb[4].mxu1 %vm84_vm1, %v1201_v44 }
 0x8ee   :  { %v1018_v45 = vpop.xlane.xlu1 %1017 }
 0x8ef   :  { %1421 = vrcp.f32 %v1018_v45 }
 0x8f9   :  { %v1422_v46 = vpop.eup %1421 }
 0x8fa   :  { %v1020_v47 = vmul.f32 %v1422_v46, %v1418_v1 }
 0x8fc   :  { %1375 = vmatmul.mubr.msk.f32.vlgmr.msra.gmra.mrb[4].mxu0 %vm84_vm1, %v1020_v47 }
 0x9bb   :  { %v1274_v48 = vpop.f32.mrb[4].mxu1 }
 0x9bc   :  { %1279 = vrot.lane.b32.xlu1 %v1274_v48, %s1574_s17  ;;  %v1381_v49 = vpop.f32.mrb[5].mxu1 }
 0x9cf   :  { %v1090_v50 = vpop.f32.mrb[4].mxu0 }
 0x9d0   :  { %v1376_v9 = vpop.f32.mrb[5].mxu0 }
 0xa2e   :  { %v1280_v51 = vpop.permute.xlu1 %1279 }
 0xa2f   :  { %v1282_v52 = vsel %vm84_vm1, %v1090_v50, %v1280_v51 }
 0xa30   :  { %v1283_v53 = vadd.f32 %v1282_v52, %v1723_v43 }
 0xa32   :  { %1284 = vst.msk [vmem:[#allocation10] sm:$0xff] %vm695_vm4, %v1283_v53  ;;  %v1285_v54 = vsel %vm695_vm4, %v1283_v53, -inf }
 0xa33   :  { %1286 = vmax.xlane.f32.xlu0 %v1285_v54 }
 0xac0   :  { %v1287_v55 = vpop.xlane.xlu0 %1286 }
 0xac1   :  { %v1288_v56 = vsub.f32 %v1283_v53, %v1287_v55 }
 0xac3   :  { %v1289_v57 = vmul.f32 1.442695, %v1288_v56 }
 0xac5   :  { %1423 = vpow2.f32 %v1289_v57 }
 0xacf   :  { %v1424_v58 = vpop.eup %1423 }
 0xad0   :  { %v1291_v59 = vsel %vm695_vm4, %v1424_v58, 0.0 }
 0xad1   :  { %1292 = vadd.xlane.f32.xlu1 %v1291_v59 }
 0xad2   :  { %1526 = shalt.err (!%p1523_p8)
}
 0xad3   :  { %s1527_s24 = scalar_lea.hbm %s1958_s5, 128 }
 0xad4   :  { %p1528_p9 = scmp.ne.s32.totalorder %s1958_s5, %s1527_s24  ;;  %p1531_p10 = scmp.lt.u32.totalorder %s1527_s24, %s1958_s5 }
 0xad6   :  { %p1533_p11 = pnand %p1531_p10, %p1528_p9 }
 0xad8   :  { %1536 = shalt.err (!%p1533_p11)
}
 0xad9   :  { %1307 = dma.vmem_to_hbm [thread:$0]  %s1305_s29, 128, %s1958_s5, [#allocation4]  }
 0xada   :  { %s1588_s14 = smov [#allocation11]  }
 0xadb   :  { %s1314_s15 = sshll.u32 %s1588_s14, 4  ;;  %s1315_s15 = int_to_ptr.vmem [resolvable:$true] %s1314_s15 }
 0xadc   :  { %s1537_s16 = scalar_lea.vmem %s1315_s15, 128  ;;  %p1542_p13 = scmp.lt.s32.totalorder %s1315_s15, %s1315_s15 }
 0xadd   :  { %p1538_p12 = scmp.ne.s32.totalorder %s1315_s15, %s1537_s16  ;;  %p1543_p0 = scmp.lt.s32.totalorder %s1537_s16, %s1537_s16 }
 0xadf   :  { %p1544_p1 = por %p1543_p0, %p1542_p13 }
 0xae1   :  { %p1545_p2 = pnand %p1544_p1, %p1538_p12 }
 0xb5e   :  { %v1293_v43 = vpop.xlane.xlu1 %1292 }
 0xb5f   :  { %1425 = vlog2.f32 %v1293_v43 }
 0xb69   :  { %v1426_v60 = vpop.eup %1425 }
 0xb6a   :  { %v1295_v61 = vmul.f32 0.6931472, %v1426_v60 }
 0xb6c   :  { %v1296_v62 = vsub.f32 %v1288_v56, %v1295_v61 }
 0xb6e   :  { %1297 = vst.msk [vmem:[#allocation11] sm:$0xff] %vm695_vm4, %v1296_v62 }
 0xb6f   :  { %1548 = shalt.err (!%p1545_p2)
}
 0xb70   :  { %s1549_s5 = scalar_lea.hbm %s1959_s6, 128 }
 0xb71   :  { %p1550_p3 = scmp.ne.s32.totalorder %s1959_s6, %s1549_s5  ;;  %p1553_p4 = scmp.lt.u32.totalorder %s1549_s5, %s1959_s6 }
 0xb73   :  { %p1555_p5 = pnand %p1553_p4, %p1550_p3 }
 0xb75   :  { %1558 = shalt.err (!%p1555_p5)
}
 0xb76   :  { %1317 = dma.vmem_to_hbm [thread:$0]  %s1315_s15, 128, %s1959_s6, [#allocation12]  }
 0xb77   :  { %1565 = dma.done.wait [#allocation4], 128  }
 0xb78   :  { %1566 = vsyncadd [#allocation4], 4294967168 }
 0xb79   :  { %1567 = dma.done.wait [#allocation12], 128  }
 0xb7a   :  { %1568 = vsyncadd [#allocation12], 4294967168 }
 0xb7b   :  { %1324 = vsyncpa [#allocation3], 1 }
 0xb7c   :  { %1325 = vsyncpa [#allocation6], 1 }
 0xb7d   :  { %1326 = vsyncpa [#allocation9], 1 }
 0xb7e   :  { %1327 = vsyncpa [#allocation4], 1 }
 0xb7f   :  { %1328 = vsyncpa [#allocation12], 1 }

</bundles_post_ra>
